<compile_context>
chip_gen: v7x
topology: tpu7x:2x2x1
jax: 0.10.0
libtpu: 0.0.40
codegen_flags: <defaults>
</compile_context>

<pallas_src>
import jax
import jax.numpy as jnp
from jax import lax
from jax.experimental import pallas as pl
from jax.experimental.pallas import tpu as pltpu

KERNEL_MUL = 2.0
KERNEL_NUM = 5
BN_EPS = 1e-5


def _mmd_adv_kernel(src_ref, tgt_ref, w1_ref, w2_ref, pk_ref, out_ref):
    src = src_ref[...].astype(jnp.float32)            # (B, D)
    tgt = tgt_ref[...].astype(jnp.float32)            # (B, D)
    B, D = src.shape
    n = 2 * B

    # ---------------- multi-kernel RBF MMD, block-Gram form (MXU) ----------------
    # A . B^T contraction pattern; Mosaic feeds the MXU directly.
    # TODO(synk): for large B, tile these (B,B) blocks over a ("parallel","arbitrary")
    # grid with pl.Buffered inputs and split rows across v7x's two TensorCores;
    # the monolithic whole-array VMEM design is right only for small batches.
    dn = (((1,), (1,)), ((), ()))
    g_ss = lax.dot_general(src, src, dn, preferred_element_type=jnp.float32)  # (B,B)
    g_st = lax.dot_general(src, tgt, dn, preferred_element_type=jnp.float32)
    g_tt = lax.dot_general(tgt, tgt, dn, preferred_element_type=jnp.float32)

    ss2 = src * src
    tt2 = tgt * tgt
    rs_col = jnp.sum(ss2, axis=1, keepdims=True)      # (B,1) ||s_i||^2
    rt_col = jnp.sum(tt2, axis=1, keepdims=True)      # (B,1) ||t_i||^2
    ones_row = jnp.ones((1, D), jnp.float32)
    # row-layout norms via a tiny MXU dot (avoids any in-kernel transpose)
    rs_row = lax.dot_general(ones_row, ss2, dn, preferred_element_type=jnp.float32)  # (1,B)
    rt_row = lax.dot_general(ones_row, tt2, dn, preferred_element_type=jnp.float32)  # (1,B)

    # clamp: cancellation can produce tiny negative distances / nonzero diagonal
    l2_ss = jnp.maximum(rs_col + rs_row - 2.0 * g_ss, 0.0)
    l2_st = jnp.maximum(rs_col + rt_row - 2.0 * g_st, 0.0)
    l2_tt = jnp.maximum(rt_col + rt_row - 2.0 * g_tt, 0.0)

    # bandwidth over the full (2B,2B) distance matrix (ts block == st^T)
    l2_total = jnp.sum(l2_ss) + jnp.sum(l2_tt) + 2.0 * jnp.sum(l2_st)
    bandwidth = l2_total / float(n * n - n)
    bandwidth = bandwidth / (KERNEL_MUL ** (KERNEL_NUM // 2))
    inv_max = 1.0 / (bandwidth * (KERNEL_MUL ** (KERNEL_NUM - 1)))

    def kernel_block_sum(l2):
        # kernel_mul == 2: each narrower kernel is the elementwise square of the
        # previous one -> a single exp per block.
        e = jnp.exp(-l2 * inv_max)
        k = e
        for _ in range(KERNEL_NUM - 1):
            e = e * e
            k = k + e
        return jnp.sum(k)

    mmd = (kernel_block_sum(l2_ss) + kernel_block_sum(l2_tt)
           - 2.0 * kernel_block_sum(l2_st)) / float(B * B)

    # ---------------- adversarial BCE loss (per-branch discriminator) ----------------
    # TODO(synk): ReverseLayerF (gradient reversal) and the LambdaScheduler only affect
    # the backward pass / training step; the forward value is the plain discriminator BCE.
    p = pk_ref[...].astype(jnp.float32)               # (8, H) packed small params
    b1, g1, be1 = p[0:1, :], p[1:2, :], p[2:3, :]
    b2, g2, be2 = p[3:4, :], p[4:5, :], p[5:6, :]
    w3, b3 = p[6:7, :], p[7:8, 0:1]
    w1 = w1_ref[...]                                  # (D, H) bf16
    w2 = w2_ref[...]                                  # (H, H) bf16

    def bn_relu(h, gamma, beta):
        # training-mode BatchNorm1d, affine folded into a single scale/shift FMA
        mu = jnp.mean(h, axis=0, keepdims=True)
        d = h - mu
        var = jnp.mean(d * d, axis=0, keepdims=True)
        scale = lax.rsqrt(var + BN_EPS) * gamma
        shift = beta - mu * scale
        return jnp.maximum(h * scale + shift, 0.0)

    def disc_logit(x):
        # bf16 MXU operands, f32 accumulate; BN/BCE path is insensitive to bf16
        h = jnp.dot(x.astype(jnp.bfloat16), w1,
                    preferred_element_type=jnp.float32) + b1
        h = bn_relu(h, g1, be1)
        h = jnp.dot(h.astype(jnp.bfloat16), w2,
                    preferred_element_type=jnp.float32) + b2
        h = bn_relu(h, g2, be2)
        return jnp.sum(h * w3, axis=1, keepdims=True) + b3        # (B, 1)

    logit_s = disc_logit(src)
    logit_t = disc_logit(tgt)

    # BCE in log-sigmoid form: -log(sigmoid(z)) = softplus(-z); torch BCELoss
    # clamps log at -100, i.e. the per-row loss is clamped at 100.
    def softplus(z):
        return jnp.maximum(z, 0.0) + jnp.log(1.0 + jnp.exp(-jnp.abs(z)))

    src_loss = jnp.mean(jnp.minimum(softplus(-logit_s), 100.0))   # label 1
    tgt_loss = jnp.mean(jnp.minimum(softplus(logit_t), 100.0))    # label 0
    adv = 0.5 * (src_loss + tgt_loss)

    out_ref[0, 0] = mmd + adv


def mmd_adv_loss(source, target, params):
    H = params["w1"].shape[1]
    # 8 tiny (1,H) parameter vectors packed into one VMEM operand (b3 stored at [7,0])
    b3_row = jnp.zeros((1, H), jnp.float32).at[0, 0].set(params["b3"][0, 0])
    packed = jnp.concatenate([params["b1"], params["g1"], params["be1"],
                              params["b2"], params["g2"], params["be2"],
                              params["w3"], b3_row], axis=0)          # (8, H)

    vmem = pl.BlockSpec(memory_space=pltpu.MemorySpace.VMEM)
    out = pl.pallas_call(
        _mmd_adv_kernel,
        out_shape=jax.ShapeDtypeStruct((1, 1), jnp.float32),
        in_specs=[vmem, vmem, vmem, vmem, vmem],
        out_specs=pl.BlockSpec(memory_space=pltpu.MemorySpace.SMEM),
        compiler_params=pltpu.CompilerParams(vmem_limit_bytes=32 * 1024 * 1024),
    )(source.astype(jnp.float32), target.astype(jnp.float32),
      params["w1"].astype(jnp.bfloat16), params["w2"].astype(jnp.bfloat16),
      packed)
    return out[0, 0]


# -------------------- pure-JAX reference (for correctness check) --------------------
def reference_loss(source, target, p):
    src = source.astype(jnp.float32)
    tgt = target.astype(jnp.float32)
    B = src.shape[0]
    n = 2 * B
    total = jnp.concatenate([src, tgt], axis=0)
    diff = total[None, :, :] - total[:, None, :]
    l2 = jnp.sum(diff * diff, axis=-1)
    bw = jnp.sum(l2) / float(n * n - n)
    bw = bw / (KERNEL_MUL ** (KERNEL_NUM // 2))
    kern = sum(jnp.exp(-l2 / (bw * (KERNEL_MUL ** i))) for i in range(KERNEL_NUM))
    mmd = (jnp.mean(kern[:B, :B]) + jnp.mean(kern[B:, B:])
           - jnp.mean(kern[:B, B:]) - jnp.mean(kern[B:, :B]))

    def disc(x):
        h = x @ p["w1"] + p["b1"]
        mu = jnp.mean(h, 0, keepdims=True)
        var = jnp.mean((h - mu) ** 2, 0, keepdims=True)
        h = jnp.maximum((h - mu) * lax.rsqrt(var + BN_EPS) * p["g1"] + p["be1"], 0.0)
        h = h @ p["w2"] + p["b2"]
        mu = jnp.mean(h, 0, keepdims=True)
        var = jnp.mean((h - mu) ** 2, 0, keepdims=True)
        h = jnp.maximum((h - mu) * lax.rsqrt(var + BN_EPS) * p["g2"] + p["be2"], 0.0)
        logit = jnp.sum(h * p["w3"], axis=1, keepdims=True) + p["b3"]
        return 1.0 / (1.0 + jnp.exp(-logit))

    ps, pt = disc(src), disc(tgt)
    adv = 0.5 * (-jnp.mean(jnp.maximum(jnp.log(ps), -100.0))
                 - jnp.mean(jnp.maximum(jnp.log(1.0 - pt), -100.0)))
    return mmd + adv


if __name__ == "__main__":
    B, D, H = 8, 128, 128   # small synthetic shapes: batch=8, feature=128, disc hidden=128

    key = jax.random.PRNGKey(0)
    ks = jax.random.split(key, 8)
    source = jax.random.normal(ks[0], (B, D), jnp.float32)
    target = jax.random.normal(ks[1], (B, D), jnp.float32) + 0.5

    def lin_init(k, fan_in, shape):
        bound = 1.0 / (fan_in ** 0.5)
        return jax.random.uniform(k, shape, jnp.float32, -bound, bound)

    params = {
        "w1": lin_init(ks[2], D, (D, H)),
        "b1": jnp.zeros((1, H), jnp.float32),
        "g1": jnp.ones((1, H), jnp.float32),
        "be1": jnp.zeros((1, H), jnp.float32),
        "w2": lin_init(ks[3], H, (H, H)),
        "b2": jnp.zeros((1, H), jnp.float32),
        "g2": jnp.ones((1, H), jnp.float32),
        "be2": jnp.zeros((1, H), jnp.float32),
        "w3": lin_init(ks[4], H, (1, H)),     # torch Linear(H,1) weight layout (out,in)
        "b3": jnp.zeros((1, 1), jnp.float32),
    }

    loss = jax.block_until_ready(mmd_adv_loss(source, target, params))
    ref = jax.block_until_ready(reference_loss(source, target, params))

    assert jnp.isfinite(loss), f"non-finite loss: {loss}"
    # tolerance covers bf16 MXU operands in the discriminator (f32 accumulate)
    assert abs(float(loss) - float(ref)) <= 2e-2 * max(1.0, abs(float(ref))), \
        f"mismatch: pallas={float(loss)} ref={float(ref)}"
    print("KERNEL_OK")
</pallas_src>

<mosaic_0001>
module attributes {stable_mosaic.version = 11 : i64} {
  func.func @_mmd_adv_kernel(%arg0: memref<8x128xf32, #tpu.memory_space<vmem>>, %arg1: memref<8x128xf32, #tpu.memory_space<vmem>>, %arg2: memref<128x128xbf16, #tpu.memory_space<vmem>>, %arg3: memref<128x128xbf16, #tpu.memory_space<vmem>>, %arg4: memref<8x128xf32, #tpu.memory_space<vmem>>, %arg5: memref<1x1xf32, #tpu.memory_space<smem>>) attributes {dimension_semantics = [], scalar_prefetch = 0 : i64, scratch_operands = 0 : i64, tpu.core_type = #tpu.core_type<tc>} {
    %c0 = arith.constant 0 : index
    %c0_0 = arith.constant 0 : index
    %0 = vector.load %arg0[%c0, %c0_0] : memref<8x128xf32, #tpu.memory_space<vmem>>, vector<8x128xf32>
    %c0_1 = arith.constant 0 : index
    %c0_2 = arith.constant 0 : index
    %1 = vector.load %arg1[%c0_1, %c0_2] : memref<8x128xf32, #tpu.memory_space<vmem>>, vector<8x128xf32>
    %cst = arith.constant dense<0.000000e+00> : vector<8x8xf32>
    %2 = tpu.matmul %0, %0, %cst {dimension_numbers = #tpu.dot_dimension_numbers<[1], [1], [0], [0], [0, 0, 1, 0], [], []>} : vector<8x128xf32>, vector<8x128xf32>, vector<8x8xf32> -> vector<8x8xf32>
    %cst_3 = arith.constant dense<0.000000e+00> : vector<8x8xf32>
    %3 = tpu.matmul %0, %1, %cst_3 {dimension_numbers = #tpu.dot_dimension_numbers<[1], [1], [0], [0], [0, 0, 1, 0], [], []>} : vector<8x128xf32>, vector<8x128xf32>, vector<8x8xf32> -> vector<8x8xf32>
    %cst_4 = arith.constant dense<0.000000e+00> : vector<8x8xf32>
    %4 = tpu.matmul %1, %1, %cst_4 {dimension_numbers = #tpu.dot_dimension_numbers<[1], [1], [0], [0], [0, 0, 1, 0], [], []>} : vector<8x128xf32>, vector<8x128xf32>, vector<8x8xf32> -> vector<8x8xf32>
    %5 = arith.mulf %0, %0 : vector<8x128xf32>
    %6 = arith.mulf %1, %1 : vector<8x128xf32>
    %cst_5 = arith.constant dense<0.000000e+00> : vector<8xf32>
    %7 = vector.multi_reduction <add>, %5, %cst_5 [1] : vector<8x128xf32> to vector<8xf32>
    %8 = vector.shape_cast %7 : vector<8xf32> to vector<8x1xf32>
    %cst_6 = arith.constant dense<0.000000e+00> : vector<8xf32>
    %9 = vector.multi_reduction <add>, %6, %cst_6 [1] : vector<8x128xf32> to vector<8xf32>
    %10 = vector.shape_cast %9 : vector<8xf32> to vector<8x1xf32>
    %cst_7 = arith.constant 1.000000e+00 : f32
    %11 = vector.broadcast %cst_7 : f32 to vector<1x128xf32>
    %cst_8 = arith.constant dense<0.000000e+00> : vector<1x8xf32>
    %12 = tpu.matmul %11, %5, %cst_8 {dimension_numbers = #tpu.dot_dimension_numbers<[1], [1], [0], [0], [0, 0, 1, 0], [], []>} : vector<1x128xf32>, vector<8x128xf32>, vector<1x8xf32> -> vector<1x8xf32>
    %cst_9 = arith.constant dense<0.000000e+00> : vector<1x8xf32>
    %13 = tpu.matmul %11, %6, %cst_9 {dimension_numbers = #tpu.dot_dimension_numbers<[1], [1], [0], [0], [0, 0, 1, 0], [], []>} : vector<1x128xf32>, vector<8x128xf32>, vector<1x8xf32> -> vector<1x8xf32>
    %14 = vector.broadcast %8 : vector<8x1xf32> to vector<8x8xf32>
    %15 = vector.broadcast %12 : vector<1x8xf32> to vector<8x8xf32>
    %16 = arith.addf %14, %15 : vector<8x8xf32>
    %cst_10 = arith.constant 2.000000e+00 : f32
    %17 = vector.broadcast %cst_10 : f32 to vector<8x8xf32>
    %18 = arith.mulf %17, %2 : vector<8x8xf32>
    %19 = arith.subf %16, %18 : vector<8x8xf32>
    %cst_11 = arith.constant 0.000000e+00 : f32
    %20 = vector.broadcast %cst_11 : f32 to vector<8x8xf32>
    %21 = arith.maximumf %19, %20 : vector<8x8xf32>
    %22 = vector.broadcast %8 : vector<8x1xf32> to vector<8x8xf32>
    %23 = vector.broadcast %13 : vector<1x8xf32> to vector<8x8xf32>
    %24 = arith.addf %22, %23 : vector<8x8xf32>
    %cst_12 = arith.constant 2.000000e+00 : f32
    %25 = vector.broadcast %cst_12 : f32 to vector<8x8xf32>
    %26 = arith.mulf %25, %3 : vector<8x8xf32>
    %27 = arith.subf %24, %26 : vector<8x8xf32>
    %cst_13 = arith.constant 0.000000e+00 : f32
    %28 = vector.broadcast %cst_13 : f32 to vector<8x8xf32>
    %29 = arith.maximumf %27, %28 : vector<8x8xf32>
    %30 = vector.broadcast %10 : vector<8x1xf32> to vector<8x8xf32>
    %31 = vector.broadcast %13 : vector<1x8xf32> to vector<8x8xf32>
    %32 = arith.addf %30, %31 : vector<8x8xf32>
    %cst_14 = arith.constant 2.000000e+00 : f32
    %33 = vector.broadcast %cst_14 : f32 to vector<8x8xf32>
    %34 = arith.mulf %33, %4 : vector<8x8xf32>
    %35 = arith.subf %32, %34 : vector<8x8xf32>
    %cst_15 = arith.constant 0.000000e+00 : f32
    %36 = vector.broadcast %cst_15 : f32 to vector<8x8xf32>
    %37 = arith.maximumf %35, %36 : vector<8x8xf32>
    %38 = vector.shape_cast %21 : vector<8x8xf32> to vector<1x8x8xf32>
    %cst_16 = arith.constant dense<0.000000e+00> : vector<1xf32>
    %39 = vector.multi_reduction <add>, %38, %cst_16 [1, 2] : vector<1x8x8xf32> to vector<1xf32>
    %40 = vector.shape_cast %39 : vector<1xf32> to vector<1x1x1xf32>
    %41 = vector.extract %40[0, 0, 0] : f32 from vector<1x1x1xf32>
    %42 = vector.shape_cast %37 : vector<8x8xf32> to vector<1x8x8xf32>
    %cst_17 = arith.constant dense<0.000000e+00> : vector<1xf32>
    %43 = vector.multi_reduction <add>, %42, %cst_17 [1, 2] : vector<1x8x8xf32> to vector<1xf32>
    %44 = vector.shape_cast %43 : vector<1xf32> to vector<1x1x1xf32>
    %45 = vector.extract %44[0, 0, 0] : f32 from vector<1x1x1xf32>
    %46 = arith.addf %41, %45 : f32
    %47 = vector.shape_cast %29 : vector<8x8xf32> to vector<1x8x8xf32>
    %cst_18 = arith.constant dense<0.000000e+00> : vector<1xf32>
    %48 = vector.multi_reduction <add>, %47, %cst_18 [1, 2] : vector<1x8x8xf32> to vector<1xf32>
    %49 = vector.shape_cast %48 : vector<1xf32> to vector<1x1x1xf32>
    %50 = vector.extract %49[0, 0, 0] : f32 from vector<1x1x1xf32>
    %cst_19 = arith.constant 2.000000e+00 : f32
    %51 = arith.mulf %cst_19, %50 : f32
    %52 = arith.addf %46, %51 : f32
    %cst_20 = arith.constant 2.400000e+02 : f32
    %53 = arith.divf %52, %cst_20 : f32
    %cst_21 = arith.constant 4.000000e+00 : f32
    %54 = arith.divf %53, %cst_21 : f32
    %cst_22 = arith.constant 1.600000e+01 : f32
    %55 = arith.mulf %54, %cst_22 : f32
    %cst_23 = arith.constant 1.000000e+00 : f32
    %56 = arith.divf %cst_23, %55 : f32
    %cst_24 = arith.constant 0.000000e+00 : f32
    %57 = vector.broadcast %cst_24 : f32 to vector<8x8xf32>
    %58 = arith.subf %57, %21 : vector<8x8xf32>
    %59 = vector.broadcast %56 : f32 to vector<8x8xf32>
    %60 = arith.mulf %58, %59 : vector<8x8xf32>
    %61 = math.exp %60 : vector<8x8xf32>
    %62 = arith.mulf %61, %61 : vector<8x8xf32>
    %63 = arith.addf %61, %62 : vector<8x8xf32>
    %64 = arith.mulf %62, %62 : vector<8x8xf32>
    %65 = arith.addf %63, %64 : vector<8x8xf32>
    %66 = arith.mulf %64, %64 : vector<8x8xf32>
    %67 = arith.addf %65, %66 : vector<8x8xf32>
    %68 = arith.mulf %66, %66 : vector<8x8xf32>
    %69 = arith.addf %67, %68 : vector<8x8xf32>
    %70 = vector.shape_cast %69 : vector<8x8xf32> to vector<1x8x8xf32>
    %cst_25 = arith.constant dense<0.000000e+00> : vector<1xf32>
    %71 = vector.multi_reduction <add>, %70, %cst_25 [1, 2] : vector<1x8x8xf32> to vector<1xf32>
    %72 = vector.shape_cast %71 : vector<1xf32> to vector<1x1x1xf32>
    %73 = vector.extract %72[0, 0, 0] : f32 from vector<1x1x1xf32>
    %cst_26 = arith.constant 0.000000e+00 : f32
    %74 = vector.broadcast %cst_26 : f32 to vector<8x8xf32>
    %75 = arith.subf %74, %37 : vector<8x8xf32>
    %76 = vector.broadcast %56 : f32 to vector<8x8xf32>
    %77 = arith.mulf %75, %76 : vector<8x8xf32>
    %78 = math.exp %77 : vector<8x8xf32>
    %79 = arith.mulf %78, %78 : vector<8x8xf32>
    %80 = arith.addf %78, %79 : vector<8x8xf32>
    %81 = arith.mulf %79, %79 : vector<8x8xf32>
    %82 = arith.addf %80, %81 : vector<8x8xf32>
    %83 = arith.mulf %81, %81 : vector<8x8xf32>
    %84 = arith.addf %82, %83 : vector<8x8xf32>
    %85 = arith.mulf %83, %83 : vector<8x8xf32>
    %86 = arith.addf %84, %85 : vector<8x8xf32>
    %87 = vector.shape_cast %86 : vector<8x8xf32> to vector<1x8x8xf32>
    %cst_27 = arith.constant dense<0.000000e+00> : vector<1xf32>
    %88 = vector.multi_reduction <add>, %87, %cst_27 [1, 2] : vector<1x8x8xf32> to vector<1xf32>
    %89 = vector.shape_cast %88 : vector<1xf32> to vector<1x1x1xf32>
    %90 = vector.extract %89[0, 0, 0] : f32 from vector<1x1x1xf32>
    %91 = arith.addf %73, %90 : f32
    %cst_28 = arith.constant 0.000000e+00 : f32
    %92 = vector.broadcast %cst_28 : f32 to vector<8x8xf32>
    %93 = arith.subf %92, %29 : vector<8x8xf32>
    %94 = vector.broadcast %56 : f32 to vector<8x8xf32>
    %95 = arith.mulf %93, %94 : vector<8x8xf32>
    %96 = math.exp %95 : vector<8x8xf32>
    %97 = arith.mulf %96, %96 : vector<8x8xf32>
    %98 = arith.addf %96, %97 : vector<8x8xf32>
    %99 = arith.mulf %97, %97 : vector<8x8xf32>
    %100 = arith.addf %98, %99 : vector<8x8xf32>
    %101 = arith.mulf %99, %99 : vector<8x8xf32>
    %102 = arith.addf %100, %101 : vector<8x8xf32>
    %103 = arith.mulf %101, %101 : vector<8x8xf32>
    %104 = arith.addf %102, %103 : vector<8x8xf32>
    %105 = vector.shape_cast %104 : vector<8x8xf32> to vector<1x8x8xf32>
    %cst_29 = arith.constant dense<0.000000e+00> : vector<1xf32>
    %106 = vector.multi_reduction <add>, %105, %cst_29 [1, 2] : vector<1x8x8xf32> to vector<1xf32>
    %107 = vector.shape_cast %106 : vector<1xf32> to vector<1x1x1xf32>
    %108 = vector.extract %107[0, 0, 0] : f32 from vector<1x1x1xf32>
    %cst_30 = arith.constant 2.000000e+00 : f32
    %109 = arith.mulf %cst_30, %108 : f32
    %110 = arith.subf %91, %109 : f32
    %cst_31 = arith.constant 6.400000e+01 : f32
    %111 = arith.divf %110, %cst_31 : f32
    %c0_32 = arith.constant 0 : index
    %c0_33 = arith.constant 0 : index
    %112 = vector.load %arg4[%c0_32, %c0_33] : memref<8x128xf32, #tpu.memory_space<vmem>>, vector<8x128xf32>
    %113 = vector.extract_strided_slice %112 {offsets = [0, 0], sizes = [1, 128], strides = [1, 1]} : vector<8x128xf32> to vector<1x128xf32>
    %114 = vector.extract_strided_slice %112 {offsets = [1, 0], sizes = [1, 128], strides = [1, 1]} : vector<8x128xf32> to vector<1x128xf32>
    %115 = vector.extract_strided_slice %112 {offsets = [2, 0], sizes = [1, 128], strides = [1, 1]} : vector<8x128xf32> to vector<1x128xf32>
    %116 = vector.extract_strided_slice %112 {offsets = [3, 0], sizes = [1, 128], strides = [1, 1]} : vector<8x128xf32> to vector<1x128xf32>
    %117 = vector.extract_strided_slice %112 {offsets = [4, 0], sizes = [1, 128], strides = [1, 1]} : vector<8x128xf32> to vector<1x128xf32>
    %118 = vector.extract_strided_slice %112 {offsets = [5, 0], sizes = [1, 128], strides = [1, 1]} : vector<8x128xf32> to vector<1x128xf32>
    %119 = vector.extract_strided_slice %112 {offsets = [6, 0], sizes = [1, 128], strides = [1, 1]} : vector<8x128xf32> to vector<1x128xf32>
    %120 = vector.extract_strided_slice %112 {offsets = [7, 0], sizes = [1, 1], strides = [1, 1]} : vector<8x128xf32> to vector<1x1xf32>
    %c0_34 = arith.constant 0 : index
    %c0_35 = arith.constant 0 : index
    %121 = vector.load %arg2[%c0_34, %c0_35] : memref<128x128xbf16, #tpu.memory_space<vmem>>, vector<128x128xbf16>
    %c0_36 = arith.constant 0 : index
    %c0_37 = arith.constant 0 : index
    %122 = vector.load %arg3[%c0_36, %c0_37] : memref<128x128xbf16, #tpu.memory_space<vmem>>, vector<128x128xbf16>
    %123 = arith.truncf %0 : vector<8x128xf32> to vector<8x128xbf16>
    %cst_38 = arith.constant dense<0.000000e+00> : vector<8x128xf32>
    %124 = tpu.matmul %123, %121, %cst_38 {dimension_numbers = #tpu.dot_dimension_numbers<[1], [0], [0], [1], [0, 0, 1, 1], [], []>} : vector<8x128xbf16>, vector<128x128xbf16>, vector<8x128xf32> -> vector<8x128xf32>
    %125 = vector.broadcast %113 : vector<1x128xf32> to vector<8x128xf32>
    %126 = arith.addf %124, %125 : vector<8x128xf32>
    %cst_39 = arith.constant dense<0.000000e+00> : vector<128xf32>
    %127 = vector.multi_reduction <add>, %126, %cst_39 [0] : vector<8x128xf32> to vector<128xf32>
    %128 = vector.shape_cast %127 : vector<128xf32> to vector<1x128xf32>
    %cst_40 = arith.constant 8.000000e+00 : f32
    %129 = vector.broadcast %cst_40 : f32 to vector<1x128xf32>
    %130 = arith.divf %128, %129 : vector<1x128xf32>
    %131 = vector.broadcast %130 : vector<1x128xf32> to vector<8x128xf32>
    %132 = arith.subf %126, %131 : vector<8x128xf32>
    %133 = arith.mulf %132, %132 : vector<8x128xf32>
    %cst_41 = arith.constant dense<0.000000e+00> : vector<128xf32>
    %134 = vector.multi_reduction <add>, %133, %cst_41 [0] : vector<8x128xf32> to vector<128xf32>
    %135 = vector.shape_cast %134 : vector<128xf32> to vector<1x128xf32>
    %cst_42 = arith.constant 8.000000e+00 : f32
    %136 = vector.broadcast %cst_42 : f32 to vector<1x128xf32>
    %137 = arith.divf %135, %136 : vector<1x128xf32>
    %cst_43 = arith.constant 9.99999974E-6 : f32
    %138 = vector.broadcast %cst_43 : f32 to vector<1x128xf32>
    %139 = arith.addf %137, %138 : vector<1x128xf32>
    %140 = math.rsqrt %139 : vector<1x128xf32>
    %141 = arith.mulf %140, %114 : vector<1x128xf32>
    %142 = arith.mulf %130, %141 : vector<1x128xf32>
    %143 = arith.subf %115, %142 : vector<1x128xf32>
    %144 = vector.broadcast %141 : vector<1x128xf32> to vector<8x128xf32>
    %145 = arith.mulf %126, %144 : vector<8x128xf32>
    %146 = vector.broadcast %143 : vector<1x128xf32> to vector<8x128xf32>
    %147 = arith.addf %145, %146 : vector<8x128xf32>
    %cst_44 = arith.constant 0.000000e+00 : f32
    %148 = vector.broadcast %cst_44 : f32 to vector<8x128xf32>
    %149 = arith.maximumf %147, %148 : vector<8x128xf32>
    %150 = arith.truncf %149 : vector<8x128xf32> to vector<8x128xbf16>
    %cst_45 = arith.constant dense<0.000000e+00> : vector<8x128xf32>
    %151 = tpu.matmul %150, %122, %cst_45 {dimension_numbers = #tpu.dot_dimension_numbers<[1], [0], [0], [1], [0, 0, 1, 1], [], []>} : vector<8x128xbf16>, vector<128x128xbf16>, vector<8x128xf32> -> vector<8x128xf32>
    %152 = vector.broadcast %116 : vector<1x128xf32> to vector<8x128xf32>
    %153 = arith.addf %151, %152 : vector<8x128xf32>
    %cst_46 = arith.constant dense<0.000000e+00> : vector<128xf32>
    %154 = vector.multi_reduction <add>, %153, %cst_46 [0] : vector<8x128xf32> to vector<128xf32>
    %155 = vector.shape_cast %154 : vector<128xf32> to vector<1x128xf32>
    %cst_47 = arith.constant 8.000000e+00 : f32
    %156 = vector.broadcast %cst_47 : f32 to vector<1x128xf32>
    %157 = arith.divf %155, %156 : vector<1x128xf32>
    %158 = vector.broadcast %157 : vector<1x128xf32> to vector<8x128xf32>
    %159 = arith.subf %153, %158 : vector<8x128xf32>
    %160 = arith.mulf %159, %159 : vector<8x128xf32>
    %cst_48 = arith.constant dense<0.000000e+00> : vector<128xf32>
    %161 = vector.multi_reduction <add>, %160, %cst_48 [0] : vector<8x128xf32> to vector<128xf32>
    %162 = vector.shape_cast %161 : vector<128xf32> to vector<1x128xf32>
    %cst_49 = arith.constant 8.000000e+00 : f32
    %163 = vector.broadcast %cst_49 : f32 to vector<1x128xf32>
    %164 = arith.divf %162, %163 : vector<1x128xf32>
    %cst_50 = arith.constant 9.99999974E-6 : f32
    %165 = vector.broadcast %cst_50 : f32 to vector<1x128xf32>
    %166 = arith.addf %164, %165 : vector<1x128xf32>
    %167 = math.rsqrt %166 : vector<1x128xf32>
    %168 = arith.mulf %167, %117 : vector<1x128xf32>
    %169 = arith.mulf %157, %168 : vector<1x128xf32>
    %170 = arith.subf %118, %169 : vector<1x128xf32>
    %171 = vector.broadcast %168 : vector<1x128xf32> to vector<8x128xf32>
    %172 = arith.mulf %153, %171 : vector<8x128xf32>
    %173 = vector.broadcast %170 : vector<1x128xf32> to vector<8x128xf32>
    %174 = arith.addf %172, %173 : vector<8x128xf32>
    %cst_51 = arith.constant 0.000000e+00 : f32
    %175 = vector.broadcast %cst_51 : f32 to vector<8x128xf32>
    %176 = arith.maximumf %174, %175 : vector<8x128xf32>
    %177 = vector.broadcast %119 : vector<1x128xf32> to vector<8x128xf32>
    %178 = arith.mulf %176, %177 : vector<8x128xf32>
    %cst_52 = arith.constant dense<0.000000e+00> : vector<8xf32>
    %179 = vector.multi_reduction <add>, %178, %cst_52 [1] : vector<8x128xf32> to vector<8xf32>
    %180 = vector.shape_cast %179 : vector<8xf32> to vector<8x1xf32>
    %181 = vector.broadcast %120 : vector<1x1xf32> to vector<8x1xf32>
    %182 = arith.addf %180, %181 : vector<8x1xf32>
    %183 = arith.truncf %1 : vector<8x128xf32> to vector<8x128xbf16>
    %cst_53 = arith.constant dense<0.000000e+00> : vector<8x128xf32>
    %184 = tpu.matmul %183, %121, %cst_53 {dimension_numbers = #tpu.dot_dimension_numbers<[1], [0], [0], [1], [0, 0, 1, 1], [], []>} : vector<8x128xbf16>, vector<128x128xbf16>, vector<8x128xf32> -> vector<8x128xf32>
    %185 = vector.broadcast %113 : vector<1x128xf32> to vector<8x128xf32>
    %186 = arith.addf %184, %185 : vector<8x128xf32>
    %cst_54 = arith.constant dense<0.000000e+00> : vector<128xf32>
    %187 = vector.multi_reduction <add>, %186, %cst_54 [0] : vector<8x128xf32> to vector<128xf32>
    %188 = vector.shape_cast %187 : vector<128xf32> to vector<1x128xf32>
    %cst_55 = arith.constant 8.000000e+00 : f32
    %189 = vector.broadcast %cst_55 : f32 to vector<1x128xf32>
    %190 = arith.divf %188, %189 : vector<1x128xf32>
    %191 = vector.broadcast %190 : vector<1x128xf32> to vector<8x128xf32>
    %192 = arith.subf %186, %191 : vector<8x128xf32>
    %193 = arith.mulf %192, %192 : vector<8x128xf32>
    %cst_56 = arith.constant dense<0.000000e+00> : vector<128xf32>
    %194 = vector.multi_reduction <add>, %193, %cst_56 [0] : vector<8x128xf32> to vector<128xf32>
    %195 = vector.shape_cast %194 : vector<128xf32> to vector<1x128xf32>
    %cst_57 = arith.constant 8.000000e+00 : f32
    %196 = vector.broadcast %cst_57 : f32 to vector<1x128xf32>
    %197 = arith.divf %195, %196 : vector<1x128xf32>
    %cst_58 = arith.constant 9.99999974E-6 : f32
    %198 = vector.broadcast %cst_58 : f32 to vector<1x128xf32>
    %199 = arith.addf %197, %198 : vector<1x128xf32>
    %200 = math.rsqrt %199 : vector<1x128xf32>
    %201 = arith.mulf %200, %114 : vector<1x128xf32>
    %202 = arith.mulf %190, %201 : vector<1x128xf32>
    %203 = arith.subf %115, %202 : vector<1x128xf32>
    %204 = vector.broadcast %201 : vector<1x128xf32> to vector<8x128xf32>
    %205 = arith.mulf %186, %204 : vector<8x128xf32>
    %206 = vector.broadcast %203 : vector<1x128xf32> to vector<8x128xf32>
    %207 = arith.addf %205, %206 : vector<8x128xf32>
    %cst_59 = arith.constant 0.000000e+00 : f32
    %208 = vector.broadcast %cst_59 : f32 to vector<8x128xf32>
    %209 = arith.maximumf %207, %208 : vector<8x128xf32>
    %210 = arith.truncf %209 : vector<8x128xf32> to vector<8x128xbf16>
    %cst_60 = arith.constant dense<0.000000e+00> : vector<8x128xf32>
    %211 = tpu.matmul %210, %122, %cst_60 {dimension_numbers = #tpu.dot_dimension_numbers<[1], [0], [0], [1], [0, 0, 1, 1], [], []>} : vector<8x128xbf16>, vector<128x128xbf16>, vector<8x128xf32> -> vector<8x128xf32>
    %212 = vector.broadcast %116 : vector<1x128xf32> to vector<8x128xf32>
    %213 = arith.addf %211, %212 : vector<8x128xf32>
    %cst_61 = arith.constant dense<0.000000e+00> : vector<128xf32>
    %214 = vector.multi_reduction <add>, %213, %cst_61 [0] : vector<8x128xf32> to vector<128xf32>
    %215 = vector.shape_cast %214 : vector<128xf32> to vector<1x128xf32>
    %cst_62 = arith.constant 8.000000e+00 : f32
    %216 = vector.broadcast %cst_62 : f32 to vector<1x128xf32>
    %217 = arith.divf %215, %216 : vector<1x128xf32>
    %218 = vector.broadcast %217 : vector<1x128xf32> to vector<8x128xf32>
    %219 = arith.subf %213, %218 : vector<8x128xf32>
    %220 = arith.mulf %219, %219 : vector<8x128xf32>
    %cst_63 = arith.constant dense<0.000000e+00> : vector<128xf32>
    %221 = vector.multi_reduction <add>, %220, %cst_63 [0] : vector<8x128xf32> to vector<128xf32>
    %222 = vector.shape_cast %221 : vector<128xf32> to vector<1x128xf32>
    %cst_64 = arith.constant 8.000000e+00 : f32
    %223 = vector.broadcast %cst_64 : f32 to vector<1x128xf32>
    %224 = arith.divf %222, %223 : vector<1x128xf32>
    %cst_65 = arith.constant 9.99999974E-6 : f32
    %225 = vector.broadcast %cst_65 : f32 to vector<1x128xf32>
    %226 = arith.addf %224, %225 : vector<1x128xf32>
    %227 = math.rsqrt %226 : vector<1x128xf32>
    %228 = arith.mulf %227, %117 : vector<1x128xf32>
    %229 = arith.mulf %217, %228 : vector<1x128xf32>
    %230 = arith.subf %118, %229 : vector<1x128xf32>
    %231 = vector.broadcast %228 : vector<1x128xf32> to vector<8x128xf32>
    %232 = arith.mulf %213, %231 : vector<8x128xf32>
    %233 = vector.broadcast %230 : vector<1x128xf32> to vector<8x128xf32>
    %234 = arith.addf %232, %233 : vector<8x128xf32>
    %cst_66 = arith.constant 0.000000e+00 : f32
    %235 = vector.broadcast %cst_66 : f32 to vector<8x128xf32>
    %236 = arith.maximumf %234, %235 : vector<8x128xf32>
    %237 = vector.broadcast %119 : vector<1x128xf32> to vector<8x128xf32>
    %238 = arith.mulf %236, %237 : vector<8x128xf32>
    %cst_67 = arith.constant dense<0.000000e+00> : vector<8xf32>
    %239 = vector.multi_reduction <add>, %238, %cst_67 [1] : vector<8x128xf32> to vector<8xf32>
    %240 = vector.shape_cast %239 : vector<8xf32> to vector<8x1xf32>
    %241 = vector.broadcast %120 : vector<1x1xf32> to vector<8x1xf32>
    %242 = arith.addf %240, %241 : vector<8x1xf32>
    %cst_68 = arith.constant 0.000000e+00 : f32
    %243 = vector.broadcast %cst_68 : f32 to vector<8x1xf32>
    %244 = arith.subf %243, %182 : vector<8x1xf32>
    %cst_69 = arith.constant 0.000000e+00 : f32
    %245 = vector.broadcast %cst_69 : f32 to vector<8x1xf32>
    %246 = arith.maximumf %244, %245 : vector<8x1xf32>
    %247 = math.absf %244 : vector<8x1xf32>
    %cst_70 = arith.constant 0.000000e+00 : f32
    %248 = vector.broadcast %cst_70 : f32 to vector<8x1xf32>
    %249 = arith.subf %248, %247 : vector<8x1xf32>
    %250 = math.exp %249 : vector<8x1xf32>
    %cst_71 = arith.constant 1.000000e+00 : f32
    %251 = vector.broadcast %cst_71 : f32 to vector<8x1xf32>
    %252 = arith.addf %251, %250 : vector<8x1xf32>
    %253 = math.log %252 : vector<8x1xf32>
    %254 = arith.addf %246, %253 : vector<8x1xf32>
    %cst_72 = arith.constant 1.000000e+02 : f32
    %255 = vector.broadcast %cst_72 : f32 to vector<8x1xf32>
    %256 = arith.minimumf %254, %255 : vector<8x1xf32>
    %257 = vector.shape_cast %256 : vector<8x1xf32> to vector<1x8x1xf32>
    %cst_73 = arith.constant dense<0.000000e+00> : vector<1xf32>
    %258 = vector.multi_reduction <add>, %257, %cst_73 [1, 2] : vector<1x8x1xf32> to vector<1xf32>
    %259 = vector.shape_cast %258 : vector<1xf32> to vector<1x1x1xf32>
    %260 = vector.extract %259[0, 0, 0] : f32 from vector<1x1x1xf32>
    %cst_74 = arith.constant 8.000000e+00 : f32
    %261 = arith.divf %260, %cst_74 : f32
    %cst_75 = arith.constant 0.000000e+00 : f32
    %262 = vector.broadcast %cst_75 : f32 to vector<8x1xf32>
    %263 = arith.maximumf %242, %262 : vector<8x1xf32>
    %264 = math.absf %242 : vector<8x1xf32>
    %cst_76 = arith.constant 0.000000e+00 : f32
    %265 = vector.broadcast %cst_76 : f32 to vector<8x1xf32>
    %266 = arith.subf %265, %264 : vector<8x1xf32>
    %267 = math.exp %266 : vector<8x1xf32>
    %cst_77 = arith.constant 1.000000e+00 : f32
    %268 = vector.broadcast %cst_77 : f32 to vector<8x1xf32>
    %269 = arith.addf %268, %267 : vector<8x1xf32>
    %270 = math.log %269 : vector<8x1xf32>
    %271 = arith.addf %263, %270 : vector<8x1xf32>
    %cst_78 = arith.constant 1.000000e+02 : f32
    %272 = vector.broadcast %cst_78 : f32 to vector<8x1xf32>
    %273 = arith.minimumf %271, %272 : vector<8x1xf32>
    %274 = vector.shape_cast %273 : vector<8x1xf32> to vector<1x8x1xf32>
    %cst_79 = arith.constant dense<0.000000e+00> : vector<1xf32>
    %275 = vector.multi_reduction <add>, %274, %cst_79 [1, 2] : vector<1x8x1xf32> to vector<1xf32>
    %276 = vector.shape_cast %275 : vector<1xf32> to vector<1x1x1xf32>
    %277 = vector.extract %276[0, 0, 0] : f32 from vector<1x1x1xf32>
    %cst_80 = arith.constant 8.000000e+00 : f32
    %278 = arith.divf %277, %cst_80 : f32
    %279 = arith.addf %261, %278 : f32
    %cst_81 = arith.constant 5.000000e-01 : f32
    %280 = arith.mulf %cst_81, %279 : f32
    %281 = arith.addf %111, %280 : f32
    %c0_82 = arith.constant 0 : index
    %c0_83 = arith.constant 0 : index
    %282 = memref.load %arg5[%c0_82, %c0_83] : memref<1x1xf32, #tpu.memory_space<smem>>
    memref.store %281, %arg5[%c0_82, %c0_83] : memref<1x1xf32, #tpu.memory_space<smem>>
    return
  }
}

</mosaic_0001>

<bundles_post_ra>
// kernel: tpu_custom_call.1
= control target key start
LH: loop header
LB: loop body
LE: loop exit
PB: predicated region body
PF: predicated region fallthrough
CT: control target
= control target key end

     0   :  { %10 = vsyncpa [#allocation3], 0  ;;  %s1691_s0 = inlined_call_operand.hbm [shape: f32[8,128], index: 0, kind: input, shape index: {}]   ;;  %s1692_s1 = inlined_call_operand.hbm [shape: f32[8,128], index: 1, kind: input, shape index: {}]   ;;  %s1693_s2 = inlined_call_operand.hbm [shape: bf16[128,128], index: 2, kind: input, shape index: {}]   ;;  %s1694_s3 = inlined_call_operand.hbm [shape: bf16[128,128], index: 3, kind: input, shape index: {}]   ;;  %s1695_s4 = inlined_call_operand.vmem [shape: f32[8,128], index: 4, kind: input, shape index: {}]   ;;  %s1696_s5 = inlined_call_operand.hbm [shape: f32[1,1], index: 5, kind: output, shape index: {}]  }
   0x1   :  { %11 = vsyncpa [#allocation6], 0 }
   0x2   :  { %12 = vsyncpa [#allocation9], 0 }
   0x3   :  { %13 = vsyncpa [#allocation4], 0  ;;  %s1436_s18 = smov [#allocation5]   ;;  %s1437_s20 = smov [#allocation2]  }
   0x4   :  { %s30_s19 = sshll.u32 %s1436_s18, 4  ;;  %s20_s21 = sshll.u32 %s1437_s20, 4  ;;  %s31_s19 = int_to_ptr.vmem [resolvable:$true] %s30_s19  ;;  %s21_s21 = int_to_ptr.vmem [resolvable:$true] %s20_s21 }
   0x5   :  { %s1330_s24 = scalar_lea.hbm %s1692_s1, 128 }
   0x6   :  { %p1331_p0 = scmp.ne.s32.totalorder %s1692_s1, %s1330_s24  ;;  %p1334_p1 = scmp.lt.u32.totalorder %s1330_s24, %s1692_s1 }
   0x8   :  { %p1336_p2 = pnand %p1334_p1, %p1331_p0 }
   0xa   :  { %1339 = shalt.err (!%p1336_p2)
}
   0xb   :  { %s1340_s29 = scalar_lea.vmem %s31_s19, 128  ;;  %p1345_p4 = scmp.lt.s32.totalorder %s31_s19, %s31_s19 }
   0xc   :  { %p1341_p3 = scmp.ne.s32.totalorder %s31_s19, %s1340_s29  ;;  %p1346_p5 = scmp.lt.s32.totalorder %s1340_s29, %s1340_s29 }
   0xe   :  { %p1347_p6 = por %p1346_p5, %p1345_p4 }
  0x10   :  { %p1348_p7 = pnand %p1347_p6, %p1341_p3 }
  0x12   :  { %1351 = shalt.err (!%p1348_p7)
}
  0x13   :  { %33 = dma.hbm_to_vmem [thread:$0]  %s1692_s1, 128, %s31_s19, [#allocation6]  }
  0x14   :  { %s1352_s9 = scalar_lea.hbm %s1691_s0, 128 }
  0x15   :  { %p1353_p8 = scmp.ne.s32.totalorder %s1691_s0, %s1352_s9  ;;  %p1356_p9 = scmp.lt.u32.totalorder %s1352_s9, %s1691_s0 }
  0x17   :  { %p1358_p10 = pnand %p1356_p9, %p1353_p8 }
  0x19   :  { %1361 = shalt.err (!%p1358_p10)
}
  0x1a   :  { %s1362_s14 = scalar_lea.vmem %s21_s21, 128  ;;  %p1367_p12 = scmp.lt.s32.totalorder %s21_s21, %s21_s21 }
  0x1b   :  { %p1363_p11 = scmp.ne.s32.totalorder %s21_s21, %s1362_s14  ;;  %p1368_p13 = scmp.lt.s32.totalorder %s1362_s14, %s1362_s14 }
  0x1d   :  { %p1369_p0 = por %p1368_p13, %p1367_p12 }
  0x1f   :  { %p1370_p1 = pnand %p1369_p0, %p1363_p11 }
  0x21   :  { %1373 = shalt.err (!%p1370_p1)
}
  0x22   :  { %23 = dma.hbm_to_vmem [thread:$0]  %s1691_s0, 128, %s21_s21, [#allocation3]  }
  0x23   :  { %s1438_s16 = smov [#allocation7]   ;;  %s1374_s20 = scalar_lea.hbm %s1693_s2, 1024 }
  0x24   :  { %s39_s17 = sshll.u32 %s1438_s16, 4  ;;  %p1375_p2 = scmp.ne.s32.totalorder %s1693_s2, %s1374_s20  ;;  %s40_s17 = int_to_ptr.vmem [resolvable:$true] %s39_s17 }
  0x25   :  { %p1378_p3 = scmp.lt.u32.totalorder %s1374_s20, %s1693_s2 }
  0x27   :  { %p1380_p4 = pnand %p1378_p3, %p1375_p2 }
  0x29   :  { %1383 = shalt.err (!%p1380_p4)
}
  0x2a   :  { %s1384_s26 = scalar_lea.vmem %s40_s17, 1024  ;;  %p1389_p6 = scmp.lt.s32.totalorder %s40_s17, %s40_s17 }
  0x2b   :  { %p1385_p5 = scmp.ne.s32.totalorder %s40_s17, %s1384_s26  ;;  %p1390_p7 = scmp.lt.s32.totalorder %s1384_s26, %s1384_s26 }
  0x2d   :  { %p1391_p8 = por %p1390_p7, %p1389_p6 }
  0x2f   :  { %p1392_p9 = pnand %p1391_p8, %p1385_p5 }
  0x31   :  { %1395 = shalt.err (!%p1392_p9)
}
  0x32   :  { %s1439_s0 = smov 64   ;;  %s1440_s21 = smov 4  }
  0x33   :  { %45 = dma.hbm_to_vmem [thread:$0]  %s1693_s2, 1024, %s40_s17, [#allocation6], %s1439_s0, %s1439_s0, %s1440_s21  }
  0x34   :  { %s1441_s29 = smov [#allocation8]   ;;  %s1396_s8 = scalar_lea.hbm %s1694_s3, 1024 }
  0x35   :  { %s51_s30 = sshll.u32 %s1441_s29, 4  ;;  %p1397_p10 = scmp.ne.s32.totalorder %s1694_s3, %s1396_s8  ;;  %s52_s30 = int_to_ptr.vmem [resolvable:$true] %s51_s30 }
  0x36   :  { %p1400_p11 = scmp.lt.u32.totalorder %s1396_s8, %s1694_s3 }
  0x38   :  { %p1402_p12 = pnand %p1400_p11, %p1397_p10 }
  0x3a   :  { %1405 = shalt.err (!%p1402_p12)
}
  0x3b   :  { %s1406_s13 = scalar_lea.vmem %s52_s30, 1024  ;;  %p1411_p0 = scmp.lt.s32.totalorder %s52_s30, %s52_s30 }
  0x3c   :  { %p1407_p13 = scmp.ne.s32.totalorder %s52_s30, %s1406_s13  ;;  %p1412_p1 = scmp.lt.s32.totalorder %s1406_s13, %s1406_s13 }
  0x3e   :  { %p1413_p2 = por %p1412_p1, %p1411_p0 }
  0x40   :  { %p1414_p3 = pnand %p1413_p2, %p1407_p13 }
  0x42   :  { %1417 = shalt.err (!%p1414_p3)
}
  0x43   :  { %57 = dma.hbm_to_vmem [thread:$0]  %s1694_s3, 1024, %s52_s30, [#allocation9], %s1439_s0, %s1439_s0, %s1440_s21  }
  0x44   :  { %1428 = dma.done.wait [#allocation3], 128  }
  0x45   :  { %1429 = vsyncadd [#allocation3], 4294967168 }
  0x46   :  { %1430 = dma.done.wait [#allocation6], 1152  }
  0x47   :  { %1431 = vsyncadd [#allocation6], 4294966144 }
  0x48   :  { %1432 = dma.done.wait [#allocation9], 1024  }
  0x49   :  { %1433 = vsyncadd [#allocation9], 4294966272  ;;  %v1442_v0 = vmov 0.0   ;;  %vm1443_vm0 = vmmov 0   ;;  %v73_v1 = vld [vmem:[#allocation2] sm:$0xff]  ;;  %v1530_v2 = vld [vmem:[#allocation5] sm:$0xff]  ;;  %v431_v24 = vlaneseq }
  0x4a   :  { %1157 = vmatprep.subr.mxu0 %v1442_v0  ;;  %1162 = vmatprep.subr.mxu1 %v1442_v0  ;;  %v285_v3 = vmul.f32 %v73_v1, %v73_v1  ;;  %v286_v4 = vmul.f32 %v1530_v2, %v1530_v2  ;;  %v1290_v5 = vld [vmem:[#allocation7] sm:$0xff]   ;;  %v1444_v6 = vmov 1.0   ;;  %v1291_v7 = vld [vmem:[#allocation7 + $0x8] sm:$0xff]   ;;  %v1292_v8 = vld [vmem:[#allocation7 + $0x10] sm:$0xff]   ;;  %v601_v14 = vpack.c.bf16 %v73_v1, %v73_v1  ;;  %s1418_s2 = scalar_lea.hbm %s1696_s5, 16 }
  0x4b   :  { %1159 = vmatprep.mubr.msk.f32.mxu0 %vm1443_vm0, %v1442_v0  ;;  %1164 = vmatprep.mubr.msk.f32.mxu1 %vm1443_vm0, %v1442_v0  ;;  %v1293_v9 = vld [vmem:[#allocation7 + $0x18] sm:$0xff]   ;;  %v1294_v10 = vld [vmem:[#allocation7 + $0x20] sm:$0xff]   ;;  %v1295_v11 = vld [vmem:[#allocation7 + $0x28] sm:$0xff]   ;;  %v870_v15 = vpack.c.bf16 %v1530_v2, %v1530_v2  ;;  %v1603_v25 = vshrl.u32 %v431_v24, 7  ;;  %vm451_vm1 = vcmask 64512   ;;  %vm1037_vm2 = vcmask 7168   ;;  %p1419_p4 = scmp.ne.s32.totalorder %s1696_s5, %s1418_s2  ;;  %p1422_p5 = scmp.lt.u32.totalorder %s1418_s2, %s1696_s5 }
  0x4c   :  { %1158 = vmatpush3.xpose.msra.mxu0 %v73_v1  ;;  %1163 = vmatpush3.xpose.msra.mxu1 %v1530_v2  ;;  %v1296_v12 = vld [vmem:[#allocation7 + $0x30] sm:$0xff]   ;;  %v1297_v13 = vld [vmem:[#allocation7 + $0x38] sm:$0xff]   ;;  %v1571_v16 = vld [vmem:[#allocation8] sm:$0xff]  }
  0x4d   :  { %1167 = vmatprep.subr.mxu0 %v1442_v0  ;;  %1172 = vmatprep.subr.mxu1 %v1442_v0  ;;  %v1575_v17 = vld [vmem:[#allocation8 + $0x8] sm:$0xff]   ;;  %v1579_v18 = vld [vmem:[#allocation8 + $0x10] sm:$0xff]   ;;  %v1583_v19 = vld [vmem:[#allocation8 + $0x18] sm:$0xff]   ;;  %v433_v29 = vsub.s32 0, %v1603_v25  ;;  %p1424_p6 = pnand %p1422_p5, %p1419_p4 }
  0x4e   :  { %287 = vadd.xlane.f32.xlu0 %v285_v3  ;;  %v1587_v20 = vld [vmem:[#allocation8 + $0x20] sm:$0xff]   ;;  %v1591_v21 = vld [vmem:[#allocation8 + $0x28] sm:$0xff]   ;;  %v1595_v22 = vld [vmem:[#allocation8 + $0x30] sm:$0xff]  }
  0x4f   :  { %1160 = vmatmul.mubr.f32.vlgmr.msra.gmra.mrb[0].mxu0 %v73_v1  ;;  %1165 = vmatmul.mubr.f32.vlgmr.msra.gmra.mrb[0].mxu1 %v73_v1  ;;  %v1599_v23 = vld [vmem:[#allocation8 + $0x38] sm:$0xff]   ;;  %v1621_v56 = vld [vmem:[%s1695_s4] sm:$0xff] }
  0x50   :  { %1168 = vmatpush3.xpose.msra.mxu0 %v1530_v2  ;;  %1173 = vmatpush3.xpose.msra.mxu1 %v285_v3  ;;  %v605_v57 = vrot.slane %v1621_v56, %v433_v29 }
  0x51   :  { %1169 = vmatprep.mubr.msk.f32.mxu0 %vm1443_vm0, %v1442_v0  ;;  %1174 = vmatprep.mubr.msk.f32.mxu1 %vm1443_vm0, %v1442_v0 }
  0x52   :  { %1177 = vmatprep.subr.mxu0 %v1442_v0  ;;  %1182 = vmatprep.subr.bf16.mxu1 %v1442_v0 }
  0x53   :  { %1170 = vmatmul.mubr.f32.vlgmr.msra.gmra.mrb[2].mxu0 %v1530_v2  ;;  %1175 = vmatmul.mubr.f32.vlgmr.msra.gmra.mrb[2].mxu1 %v1444_v6 }
  0x54   :  { %1178 = vmatpush3.xpose.msra.mxu0 %v286_v4  ;;  %1183 = vmatpush3.bf16.msra.mxu1 %v1290_v5 }
  0x55   :  { %1179 = vmatprep.mubr.msk.f32.mxu0 %vm1443_vm0, %v1442_v0  ;;  %1184 = vmatprep.subr.bf16.mxu1 %v1442_v0 }
  0x56   :  { %1198 = vmatprep.mubr.msk.bf16.mxu1 %vm1443_vm0, %v1442_v0  ;;  %289 = vadd.xlane.f32.xlu0 %v286_v4 }
  0x57   :  { %1180 = vmatmul.mubr.f32.vlgmr.msra.gmra.mrb[4].mxu0 %v1444_v6  ;;  %1202 = vmatprep.subr.bf16.mxu0 %v1442_v0 }
  0x58   :  { %1185 = vmatpush3.bf16.msra.mxu1 %v1291_v7  ;;  %1218 = vmatprep.mubr.msk.bf16.mxu0 %vm1443_vm0, %v1442_v0 }
  0x59   :  { %1186 = vmatprep.subr.bf16.mxu1 %v1442_v0  ;;  %1203 = vmatpush3.bf16.msra.mxu0 %v1571_v16 }
  0x5a   :  { %1204 = vmatprep.subr.bf16.mxu0 %v1442_v0 }
  0x5c   :  { %1187 = vmatpush3.bf16.msra.mxu1 %v1292_v8 }
  0x5d   :  { %1188 = vmatprep.subr.bf16.mxu1 %v1442_v0  ;;  %1205 = vmatpush3.bf16.msra.mxu0 %v1575_v17 }
  0x5e   :  { %1206 = vmatprep.subr.bf16.mxu0 %v1442_v0 }
  0x60   :  { %1189 = vmatpush3.bf16.msra.mxu1 %v1293_v9 }
  0x61   :  { %1190 = vmatprep.subr.bf16.mxu1 %v1442_v0  ;;  %1207 = vmatpush3.bf16.msra.mxu0 %v1579_v18 }
  0x62   :  { %1208 = vmatprep.subr.bf16.mxu0 %v1442_v0 }
  0x64   :  { %1191 = vmatpush3.bf16.msra.mxu1 %v1294_v10 }
  0x65   :  { %1192 = vmatprep.subr.bf16.mxu1 %v1442_v0  ;;  %1209 = vmatpush3.bf16.msra.mxu0 %v1583_v19 }
  0x66   :  { %1210 = vmatprep.subr.bf16.mxu0 %v1442_v0 }
  0x68   :  { %1193 = vmatpush3.bf16.msra.mxu1 %v1295_v11 }
  0x69   :  { %1194 = vmatprep.subr.bf16.mxu1 %v1442_v0  ;;  %1211 = vmatpush3.bf16.msra.mxu0 %v1587_v20 }
  0x6a   :  { %1212 = vmatprep.subr.bf16.mxu0 %v1442_v0 }
  0x6c   :  { %1195 = vmatpush3.bf16.msra.mxu1 %v1296_v12 }
  0x6d   :  { %1196 = vmatprep.subr.bf16.mxu1 %v1442_v0  ;;  %1213 = vmatpush3.bf16.msra.mxu0 %v1591_v21 }
  0x6e   :  { %1214 = vmatprep.subr.bf16.mxu0 %v1442_v0 }
  0x70   :  { %1197 = vmatpush3.bf16.msra.mxu1 %v1297_v13 }
  0x71   :  { %1222 = vmatprep.subr.bf16.mxu1 %v1442_v0  ;;  %1215 = vmatpush3.bf16.msra.mxu0 %v1595_v22 }
  0x72   :  { %1216 = vmatprep.subr.bf16.mxu0 %v1442_v0 }
  0x73   :  { %1199 = vmatmul.mubr.bf16.vlgmr.msra.gmra.mrb[4].mxu1 %v601_v14 }
  0x74   :  { %1223 = vmatpush3.bf16.msra.mxu1 %v1290_v5  ;;  %1238 = vmatprep.mubr.msk.bf16.mxu1 %vm1443_vm0, %v1442_v0 }
  0x75   :  { %1224 = vmatprep.subr.bf16.mxu1 %v1442_v0  ;;  %1217 = vmatpush3.bf16.msra.mxu0 %v1599_v23 }
  0x76   :  { %1242 = vmatprep.subr.bf16.mxu0 %v1442_v0 }
  0x78   :  { %1225 = vmatpush3.bf16.msra.mxu1 %v1291_v7 }
  0x79   :  { %1226 = vmatprep.subr.bf16.mxu1 %v1442_v0 }
  0x7c   :  { %1227 = vmatpush3.bf16.msra.mxu1 %v1292_v8 }
  0x7d   :  { %1228 = vmatprep.subr.bf16.mxu1 %v1442_v0 }
  0x80   :  { %1229 = vmatpush3.bf16.msra.mxu1 %v1293_v9 }
  0x81   :  { %1230 = vmatprep.subr.bf16.mxu1 %v1442_v0 }
  0x84   :  { %1231 = vmatpush3.bf16.msra.mxu1 %v1294_v10 }
  0x85   :  { %1232 = vmatprep.subr.bf16.mxu1 %v1442_v0 }
  0x88   :  { %1233 = vmatpush3.bf16.msra.mxu1 %v1295_v11 }
  0x89   :  { %1234 = vmatprep.subr.bf16.mxu1 %v1442_v0 }
  0x8c   :  { %1235 = vmatpush3.bf16.msra.mxu1 %v1296_v12 }
  0x8d   :  { %1236 = vmatprep.subr.bf16.mxu1 %v1442_v0 }
  0x90   :  { %1237 = vmatpush3.bf16.msra.mxu1 %v1297_v13 }
  0x93   :  { %1239 = vmatmul.mubr.bf16.vlgmr.msra.gmra.mrb[8].mxu1 %v870_v15 }
  0xdb   :  { %v288_v31 = vpop.xlane.xlu0 %287 }
  0xe3   :  { %v290_v40 = vpop.xlane.xlu0 %289 }
 0x122   :  { %v211_v26 = vpop.f32.mrb[0].mxu1  ;;  %v141_v27 = vpop.f32.mrb[0].mxu0 }
 0x123   :  { %v1166_v28 = vpop.f32.mrb[1].mxu1  ;;  %v1161_v30 = vpop.f32.mrb[1].mxu0  ;;  %v436_v34 = vmul.f32 2.0, %v141_v27  ;;  %v444_v45 = vmul.f32 2.0, %v211_v26 }
 0x126   :  { %v357_v32 = vpop.f32.mrb[2].mxu1  ;;  %v281_v33 = vpop.f32.mrb[2].mxu0 }
 0x127   :  { %v434_v35 = vrot.slane %v357_v32, %v433_v29  ;;  %v1176_v36 = vpop.f32.mrb[3].mxu1  ;;  %v1171_v37 = vpop.f32.mrb[3].mxu0  ;;  %v448_v41 = vmul.f32 2.0, %v281_v33 }
 0x129   :  { %v435_v38 = vadd.f32 %v434_v35, %v288_v31 }
 0x12a   :  { %v427_v39 = vpop.f32.mrb[4].mxu0 }
 0x12b   :  { %v442_v42 = vrot.slane %v427_v39, %v433_v29  ;;  %v437_v43 = vsub.f32 %v435_v38, %v436_v34  ;;  %v1181_v44 = vpop.f32.mrb[5].mxu0 }
 0x12d   :  { %v443_v46 = vadd.f32 %v442_v42, %v288_v31  ;;  %v447_v47 = vadd.f32 %v442_v42, %v290_v40  ;;  %v1606_v48 = vmax.f32 %v437_v43, 0.0  ;;  %v721_v40 = vsub.s32 1, %v1603_v25 }
 0x12f   :  { %v449_v49 = vsub.f32 %v447_v47, %v448_v41  ;;  %v452_v50 = vsel %vm451_vm1, %v1606_v48, 0.0  ;;  %v445_v51 = vsub.f32 %v443_v46, %v444_v45  ;;  %v726_v46 = vsub.s32 2, %v1603_v25 }
 0x130   :  { %453 = vadd.xlane.f32.xlu1 %v452_v50 }
 0x131   :  { %v1610_v52 = vmax.f32 %v449_v49, 0.0  ;;  %v1612_v53 = vmax.f32 %v445_v51, 0.0 }
 0x133   :  { %v462_v54 = vsel %vm451_vm1, %v1610_v52, 0.0  ;;  %v473_v55 = vsel %vm451_vm1, %v1612_v53, 0.0 }
 0x134   :  { %463 = vadd.xlane.f32.xlu1 %v462_v54  ;;  %474 = vadd.xlane.f32.xlu0 %v473_v55 }
 0x146   :  { %v688_v58 = vpop.f32.mrb[4].mxu1 }
 0x147   :  { %v689_v59 = vadd.f32 %v688_v58, %v605_v57  ;;  %v1200_v60 = vpop.f32.mrb[5].mxu1 }
 0x148   :  { %v691_v61 = vpop.f32.mrb[6].mxu1 }
 0x149   :  { %v694_v62 = vrot.slane %v689_v59, 4  ;;  %v1201_v63 = vpop.f32.mrb[7].mxu1 }
 0x14b   :  { %v695_v1 = vadd.f32 %v694_v62, %v689_v59 }
 0x14d   :  { %v696_v2 = vrot.slane %v695_v1, 2 }
 0x14f   :  { %v697_v3 = vadd.f32 %v696_v2, %v695_v1 }
 0x151   :  { %v698_v4 = vrot.slane %v697_v3, 1 }
 0x153   :  { %v699_v5 = vadd.f32 %v698_v4, %v697_v3 }
 0x155   :  { %v701_v6 = vmul.f32 0.125, %v699_v5 }
 0x157   :  { %v702_v7 = vsub.f32 %v689_v59, %v701_v6 }
 0x159   :  { %v703_v8 = vmul.f32 %v702_v7, %v702_v7 }
 0x15b   :  { %v704_v9 = vrot.slane %v703_v8, 4 }
 0x15d   :  { %v705_v10 = vadd.f32 %v704_v9, %v703_v8 }
 0x15f   :  { %v706_v11 = vrot.slane %v705_v10, 2 }
 0x161   :  { %v707_v12 = vadd.f32 %v706_v11, %v705_v10 }
 0x163   :  { %v708_v13 = vrot.slane %v707_v12, 1 }
 0x165   :  { %v709_v14 = vadd.f32 %v708_v13, %v707_v12 }
 0x166   :  { %v905_v15 = vpop.f32.mrb[8].mxu1 }
 0x167   :  { %v710_v24 = vmul.f32 0.125, %v709_v14  ;;  %v906_v26 = vadd.f32 %v905_v15, %v605_v57  ;;  %v1240_v27 = vpop.f32.mrb[9].mxu1 }
 0x168   :  { %v908_v28 = vpop.f32.mrb[10].mxu1 }
 0x169   :  { %v711_v29 = vadd.f32 1e-05, %v710_v24  ;;  %v911_v30 = vrot.slane %v906_v26, 4  ;;  %v1241_v31 = vpop.f32.mrb[11].mxu1 }
 0x16b   :  { %1306 = vrsqrt.f32 %v711_v29  ;;  %v912_v32 = vadd.f32 %v911_v30, %v906_v26 }
 0x16d   :  { %v913_v33 = vrot.slane %v912_v32, 2 }
 0x16f   :  { %v914_v34 = vadd.f32 %v913_v33, %v912_v32 }
 0x171   :  { %v915_v35 = vrot.slane %v914_v34, 1 }
 0x173   :  { %v916_v36 = vadd.f32 %v915_v35, %v914_v34 }
 0x175   :  { %v1307_v37 = vpop.eup %1306  ;;  %v917_v38 = vmul.f32 0.125, %v916_v36  ;;  %v733_v36 = vsub.s32 3, %v1603_v25 }
 0x176   :  { %v713_v39 = vmul.f32 %v1307_v37, %v1621_v56 }
 0x177   :  { %v918_v41 = vsub.f32 %v906_v26, %v917_v38  ;;  %v734_v37 = vrot.slane %v1621_v56, %v733_v36 }
 0x178   :  { %v714_v42 = vmul.f32 %v713_v39, %v701_v6  ;;  %v722_v45 = vrot.slane %v713_v39, %v721_v40 }
 0x179   :  { %v919_v43 = vmul.f32 %v918_v41, %v918_v41 }
 0x17a   :  { %v716_v44 = vrot.slane %v714_v42, 7  ;;  %v723_v51 = vmul.f32 %v722_v45, %v689_v59 }
 0x17b   :  { %v920_v47 = vrot.slane %v919_v43, 4 }
 0x17c   :  { %v718_v49 = vsub.f32 %v1621_v56, %v716_v44 }
 0x17d   :  { %v921_v50 = vadd.f32 %v920_v47, %v919_v43 }
 0x17e   :  { %v727_v54 = vrot.slane %v718_v49, %v726_v46 }
 0x17f   :  { %v922_v55 = vrot.slane %v921_v50, 2 }
 0x180   :  { %v728_v57 = vadd.f32 %v727_v54, %v723_v51 }
 0x181   :  { %v923_v58 = vadd.f32 %v922_v55, %v921_v50 }
 0x182   :  { %v729_v60 = vmax.f32 %v728_v57, 0.0 }
 0x183   :  { %v924_v61 = vrot.slane %v923_v58, 1 }
 0x184   :  { %v730_v62 = vpack.c.bf16 %v729_v60, %v729_v60 }
 0x185   :  { %v925_v63 = vadd.f32 %v924_v61, %v923_v58  ;;  %v495_v58 = vsub.f32 0.0, %v1606_v48 }
 0x186   :  { %1219 = vmatmul.mubr.bf16.vlgmr.msra.gmra.mrb[8].mxu0 %v730_v62 }
 0x187   :  { %v926_v1 = vmul.f32 0.125, %v925_v63  ;;  %1243 = vmatpush3.bf16.msra.mxu0 %v1571_v16  ;;  %1258 = vmatprep.mubr.msk.bf16.mxu0 %vm1443_vm0, %v1442_v0 }
 0x188   :  { %1244 = vmatprep.subr.bf16.mxu0 %v1442_v0 }
 0x189   :  { %v927_v2 = vadd.f32 1e-05, %v926_v1  ;;  %v541_v1 = vsub.f32 0.0, %v1612_v53 }
 0x18b   :  { %1308 = vrsqrt.f32 %v927_v2  ;;  %1245 = vmatpush3.bf16.msra.mxu0 %v1575_v17 }
 0x18c   :  { %1246 = vmatprep.subr.bf16.mxu0 %v1442_v0 }
 0x18f   :  { %1247 = vmatpush3.bf16.msra.mxu0 %v1579_v18 }
 0x190   :  { %1248 = vmatprep.subr.bf16.mxu0 %v1442_v0 }
 0x193   :  { %1249 = vmatpush3.bf16.msra.mxu0 %v1583_v19 }
 0x194   :  { %1250 = vmatprep.subr.bf16.mxu0 %v1442_v0 }
 0x195   :  { %v1309_v16 = vpop.eup %1308 }
 0x196   :  { %v929_v59 = vmul.f32 %v1309_v16, %v1621_v56 }
 0x197   :  { %1251 = vmatpush3.bf16.msra.mxu0 %v1587_v20 }
 0x198   :  { %v930_v3 = vmul.f32 %v929_v59, %v917_v38  ;;  %1252 = vmatprep.subr.bf16.mxu0 %v1442_v0  ;;  %v938_v17 = vrot.slane %v929_v59, %v721_v40 }
 0x19a   :  { %v932_v4 = vrot.slane %v930_v3, 7  ;;  %v939_v5 = vmul.f32 %v938_v17, %v906_v26 }
 0x19b   :  { %1253 = vmatpush3.bf16.msra.mxu0 %v1591_v21 }
 0x19c   :  { %1254 = vmatprep.subr.bf16.mxu0 %v1442_v0  ;;  %v934_v18 = vsub.f32 %v1621_v56, %v932_v4 }
 0x19e   :  { %v943_v19 = vrot.slane %v934_v18, %v726_v46 }
 0x19f   :  { %1255 = vmatpush3.bf16.msra.mxu0 %v1595_v22 }
 0x1a0   :  { %1256 = vmatprep.subr.bf16.mxu0 %v1442_v0  ;;  %v944_v6 = vadd.f32 %v943_v19, %v939_v5 }
 0x1a2   :  { %v945_v7 = vmax.f32 %v944_v6, 0.0 }
 0x1a3   :  { %1257 = vmatpush3.bf16.msra.mxu0 %v1599_v23 }
 0x1a4   :  { %v946_v20 = vpack.c.bf16 %v945_v7, %v945_v7 }
 0x1a6   :  { %1259 = vmatmul.mubr.bf16.vlgmr.msra.gmra.mrb[12].mxu0 %v946_v20 }
 0x1bd   :  { %v454_v8 = vpop.xlane.xlu1 %453 }
 0x1be   :  { %v455_v9 = vrot.slane %v454_v8, 4 }
 0x1c0   :  { %v456_v10 = vadd.f32 %v455_v9, %v454_v8 }
 0x1c1   :  { %v464_v21 = vpop.xlane.xlu1 %463  ;;  %v475_v11 = vpop.xlane.xlu0 %474 }
 0x1c2   :  { %v457_v12 = vrot.slane %v456_v10, 2  ;;  %v465_v13 = vrot.slane %v464_v21, 4  ;;  %v476_v14 = vrot.slane %v475_v11, 4 }
 0x1c4   :  { %v466_v15 = vadd.f32 %v465_v13, %v464_v21  ;;  %v477_v24 = vadd.f32 %v476_v14, %v475_v11  ;;  %v458_v26 = vadd.f32 %v457_v12, %v456_v10 }
 0x1c6   :  { %v467_v22 = vrot.slane %v466_v15, 2  ;;  %v478_v27 = vrot.slane %v477_v24, 2  ;;  %v459_v0 = vrot.slane %v458_v26, 1 }
 0x1c8   :  { %v460_v28 = vadd.f32 %v459_v0, %v458_v26  ;;  %v468_v29 = vadd.f32 %v467_v22, %v466_v15  ;;  %v479_v30 = vadd.f32 %v478_v27, %v477_v24  ;;  %v849_v26 = vsub.s32 4, %v1603_v25 }
 0x1ca   :  { %1262 = vpush %v460_v28  ;;  %v469_v23 = vrot.slane %v468_v29, 1  ;;  %v480_v31 = vrot.slane %v479_v30, 1 }
 0x1cc   :  { %v470_v32 = vadd.f32 %v469_v23, %v468_v29  ;;  %v481_v33 = vadd.f32 %v480_v31, %v479_v30 }
 0x1ce   :  { %1264 = vpush %v470_v32  ;;  %v854_v32 = vsub.s32 5, %v1603_v25 }
 0x1cf   :  { %1266 = vpush %v481_v33 }
 0x1fb   :  { %s1263_s4 = spop %1262 }
 0x1ff   :  { %s1265_s15 = spop %1264 }
 0x200   :  { %s472_s16 = sadd.f32 %s1265_s15, %s1263_s4  ;;  %s1267_s17 = spop %1266 }
 0x201   :  { %s483_s18 = smul.f32 2.0, %s1267_s17 }
 0x203   :  { %s484_s19 = sadd.f32 %s483_s18, %s472_s16 }
 0x205   :  { %s487_s20 = smul.f32 0.004166667, %s484_s19 }
 0x207   :  { %s490_s22 = smul.f32 0.25, %s487_s20 }
 0x209   :  { %s491_s23 = smul.f32 16.0, %s490_s22 }
 0x20b   :  { %v492_v34 = vstv %s491_s23 }
 0x20c   :  { %1310 = vrcp.f32 %v492_v34 }
 0x216   :  { %v1311_v35 = vpop.eup %1310 }
 0x217   :  { %1268 = vpush %v1311_v35  ;;  %v860_v35 = vsub.s32 6, %v1603_v25 }
 0x248   :  { %s1269_s24 = spop %1268 }
 0x249   :  { %v496_v57 = vstv %s1269_s24 }
 0x24a   :  { %v497_v61 = vmul.f32 %v496_v57, %v495_v58  ;;  %v542_v59 = vmul.f32 %v541_v1, %v496_v57 }
 0x24c   :  { %v498_v2 = vmul.f32 1.442695, %v497_v61  ;;  %v543_v19 = vmul.f32 1.442695, %v542_v59 }
 0x24e   :  { %1312 = vpow2.f32 %v498_v2 }
 0x258   :  { %v1313_v10 = vpop.eup %1312 }
 0x259   :  { %v817_v38 = vpop.f32.mrb[8].mxu0  ;;  %v500_v12 = vmul.f32 %v1313_v10, %v1313_v10 }
 0x25a   :  { %v1649_v39 = vadd.f32 %v817_v38, %v734_v37  ;;  %v1220_v40 = vpop.f32.mrb[9].mxu0 }
 0x25b   :  { %v820_v41 = vpop.f32.mrb[10].mxu0  ;;  %v501_v0 = vadd.f32 %v1313_v10, %v500_v12  ;;  %v502_v28 = vmul.f32 %v500_v12, %v500_v12 }
 0x25c   :  { %v823_v42 = vrot.slane %v1649_v39, 4  ;;  %v1221_v43 = vpop.f32.mrb[11].mxu0 }
 0x25d   :  { %v503_v36 = vadd.f32 %v502_v28, %v501_v0 }
 0x25e   :  { %v824_v44 = vadd.f32 %v823_v42, %v1649_v39  ;;  %v518_v42 = vsub.f32 0.0, %v1610_v52 }
 0x260   :  { %v825_v45 = vrot.slane %v824_v44, 2 }
 0x262   :  { %v826_v46 = vadd.f32 %v825_v45, %v824_v44 }
 0x264   :  { %v827_v47 = vrot.slane %v826_v46, 1 }
 0x266   :  { %v828_v49 = vadd.f32 %v827_v47, %v826_v46  ;;  %v519_v46 = vmul.f32 %v518_v42, %v496_v57 }
 0x268   :  { %v829_v50 = vmul.f32 0.125, %v828_v49  ;;  %v861_v49 = vrot.slane %v1621_v56, %v860_v35 }
 0x26a   :  { %v830_v51 = vsub.f32 %v1649_v39, %v829_v50 }
 0x26c   :  { %v831_v54 = vmul.f32 %v830_v51, %v830_v51 }
 0x26e   :  { %v832_v55 = vrot.slane %v831_v54, 4 }
 0x270   :  { %v833_v60 = vadd.f32 %v832_v55, %v831_v54 }
 0x272   :  { %v834_v62 = vrot.slane %v833_v60, 2 }
 0x274   :  { %v835_v63 = vadd.f32 %v834_v62, %v833_v60  ;;  %v520_v62 = vmul.f32 1.442695, %v519_v46 }
 0x276   :  { %v836_v16 = vrot.slane %v835_v63, 1 }
 0x278   :  { %v837_v3 = vadd.f32 %v836_v16, %v835_v63 }
 0x279   :  { %v981_v4 = vpop.f32.mrb[12].mxu0 }
 0x27a   :  { %v838_v17 = vmul.f32 0.125, %v837_v3  ;;  %v1656_v18 = vadd.f32 %v981_v4, %v734_v37  ;;  %v1260_v5 = vpop.f32.mrb[13].mxu0  ;;  %v504_v37 = vmul.f32 %v502_v28, %v502_v28  ;;  %v867_v28 = vsub.s32 7, %v1603_v25 }
 0x27b   :  { %v984_v6 = vpop.f32.mrb[14].mxu0 }
 0x27c   :  { %v839_v7 = vadd.f32 1e-05, %v838_v17  ;;  %v987_v48 = vrot.slane %v1656_v18, 4  ;;  %v1261_v20 = vpop.f32.mrb[15].mxu0  ;;  %v506_v54 = vmul.f32 %v504_v37, %v504_v37 }
 0x27e   :  { %1314 = vrsqrt.f32 %v839_v7  ;;  %v988_v8 = vadd.f32 %v987_v48, %v1656_v18 }
 0x27f   :  { %1316 = vpow2.f32 %v543_v19 }
 0x280   :  { %v989_v53 = vrot.slane %v988_v8, 2  ;;  %1318 = vpow2.f32 %v520_v62 }
 0x282   :  { %v990_v9 = vadd.f32 %v989_v53, %v988_v8 }
 0x284   :  { %v991_v21 = vrot.slane %v990_v9, 1 }
 0x286   :  { %v992_v11 = vadd.f32 %v991_v21, %v990_v9 }
 0x288   :  { %v1315_v13 = vpop.eup %1314  ;;  %v993_v14 = vmul.f32 0.125, %v992_v11 }
 0x289   :  { %v1317_v15 = vpop.eup %1316  ;;  %v841_v24 = vmul.f32 %v1315_v13, %v1621_v56 }
 0x28a   :  { %v994_v22 = vsub.f32 %v1656_v18, %v993_v14  ;;  %v545_v30 = vmul.f32 %v1317_v15, %v1317_v15  ;;  %v1319_v17 = vpop.eup %1318 }
 0x28b   :  { %v842_v27 = vmul.f32 %v841_v24, %v829_v50  ;;  %v850_v31 = vrot.slane %v841_v24, %v849_v26  ;;  %v505_v50 = vadd.f32 %v504_v37, %v503_v36  ;;  %v522_v19 = vmul.f32 %v1319_v17, %v1319_v17 }
 0x28c   :  { %v995_v29 = vmul.f32 %v994_v22, %v994_v22  ;;  %v546_v40 = vadd.f32 %v1317_v15, %v545_v30  ;;  %v547_v41 = vmul.f32 %v545_v30, %v545_v30 }
 0x28d   :  { %v844_v23 = vrot.slane %v842_v27, 7  ;;  %v851_v43 = vmul.f32 %v850_v31, %v1649_v39  ;;  %v507_v2 = vadd.f32 %v506_v54, %v505_v50  ;;  %v523_v48 = vadd.f32 %v1319_v17, %v522_v19 }
 0x28e   :  { %v996_v33 = vrot.slane %v995_v29, 4  ;;  %v548_v55 = vadd.f32 %v547_v41, %v546_v40  ;;  %v549_v58 = vmul.f32 %v547_v41, %v547_v41  ;;  %v524_v20 = vmul.f32 %v522_v19, %v522_v19 }
 0x28f   :  { %v846_v34 = vsub.f32 %v1621_v56, %v844_v23  ;;  %v508_v59 = vsel %vm451_vm1, %v507_v2, 0.0 }
 0x290   :  { %v997_v38 = vadd.f32 %v996_v33, %v995_v29  ;;  %v550_v52 = vadd.f32 %v549_v58, %v548_v55  ;;  %v551_v16 = vmul.f32 %v549_v58, %v549_v58  ;;  %v525_v10 = vadd.f32 %v524_v20, %v523_v48 }
 0x291   :  { %v855_v44 = vrot.slane %v846_v34, %v854_v32  ;;  %v526_v21 = vmul.f32 %v524_v20, %v524_v20 }
 0x292   :  { %v998_v45 = vrot.slane %v997_v38, 2  ;;  %v552_v3 = vadd.f32 %v551_v16, %v550_v52 }
 0x293   :  { %v856_v47 = vadd.f32 %v855_v44, %v851_v43  ;;  %v527_v15 = vadd.f32 %v526_v21, %v525_v10  ;;  %v528_v24 = vmul.f32 %v526_v21, %v526_v21 }
 0x294   :  { %v999_v51 = vadd.f32 %v998_v45, %v997_v38  ;;  %v553_v4 = vsel %vm451_vm1, %v552_v3, 0.0 }
 0x295   :  { %v857_v60 = vmax.f32 %v856_v47, 0.0  ;;  %v529_v0 = vadd.f32 %v528_v24, %v527_v15 }
 0x296   :  { %v1000_v61 = vrot.slane %v999_v51, 1 }
 0x297   :  { %v862_v63 = vmul.f32 %v861_v49, %v857_v60 }
 0x298   :  { %v1001_v1 = vadd.f32 %v1000_v61, %v999_v51 }
 0x299   :  { %863 = vadd.xlane.f32.xlu1 %v862_v63 }
 0x29a   :  { %v1002_v39 = vmul.f32 0.125, %v1001_v1 }
 0x29c   :  { %v1003_v57 = vadd.f32 1e-05, %v1002_v39 }
 0x29d   :  { %509 = vadd.xlane.f32.xlu1 %v508_v59 }
 0x29e   :  { %1320 = vrsqrt.f32 %v1003_v57 }
 0x2a1   :  { %554 = vadd.xlane.f32.xlu1 %v553_v4 }
 0x2a8   :  { %v1321_v5 = vpop.eup %1320 }
 0x2a9   :  { %v1005_v6 = vmul.f32 %v1321_v5, %v1621_v56 }
 0x2ab   :  { %v1006_v7 = vmul.f32 %v1005_v6, %v993_v14  ;;  %v1014_v53 = vrot.slane %v1005_v6, %v849_v26  ;;  %v530_v14 = vsel %vm451_vm1, %v529_v0, 0.0  ;;  %v868_v26 = vrot.slane %v1621_v56, %v867_v28 }
 0x2ad   :  { %v1008_v8 = vrot.slane %v1006_v7, 7  ;;  %v1015_v11 = vmul.f32 %v1014_v53, %v1656_v18 }
 0x2af   :  { %v1010_v9 = vsub.f32 %v1621_v56, %v1008_v8 }
 0x2b1   :  { %v1019_v12 = vrot.slane %v1010_v9, %v854_v32 }
 0x2b3   :  { %v1020_v13 = vadd.f32 %v1019_v12, %v1015_v11 }
 0x2b5   :  { %v1021_v22 = vmax.f32 %v1020_v13, 0.0 }
 0x2b7   :  { %v1022_v27 = vmul.f32 %v1021_v22, %v861_v49 }
 0x2b9   :  { %1023 = vadd.xlane.f32.xlu0 %v1022_v27 }
 0x2bd   :  { %531 = vadd.xlane.f32.xlu0 %v530_v14 }
 0x326   :  { %v864_v29 = vpop.xlane.xlu1 %863 }
 0x327   :  { %v869_v30 = vadd.f32 %v868_v26, %v864_v29 }
 0x329   :  { %v1026_v23 = vsub.f32 0.0, %v869_v30 }
 0x32a   :  { %v510_v31 = vpop.xlane.xlu1 %509 }
 0x32b   :  { %v1028_v18 = vand.u32 2147483647, %v1026_v23  ;;  %v511_v32 = vrot.slane %v510_v31, 4  ;;  %v1027_v47 = vmax.f32 %v1026_v23, 0.0 }
 0x32d   :  { %v1029_v33 = vsub.f32 0.0, %v1028_v18  ;;  %v512_v34 = vadd.f32 %v511_v32, %v510_v31 }
 0x32e   :  { %v555_v25 = vpop.xlane.xlu1 %554 }
 0x32f   :  { %v1030_v35 = vmul.f32 1.442695, %v1029_v33  ;;  %v513_v36 = vrot.slane %v512_v34, 2  ;;  %v556_v56 = vrot.slane %v555_v25, 4 }
 0x331   :  { %1322 = vpow2.f32 %v1030_v35  ;;  %v514_v37 = vadd.f32 %v513_v36, %v512_v34  ;;  %v557_v43 = vadd.f32 %v556_v56, %v555_v25 }
 0x333   :  { %v515_v38 = vrot.slane %v514_v37, 1  ;;  %v558_v51 = vrot.slane %v557_v43, 2 }
 0x335   :  { %v516_v40 = vadd.f32 %v515_v38, %v514_v37  ;;  %v559_v1 = vadd.f32 %v558_v51, %v557_v43 }
 0x337   :  { %1270 = vpush %v516_v40  ;;  %v560_v39 = vrot.slane %v559_v1, 1 }
 0x339   :  { %v561_v3 = vadd.f32 %v560_v39, %v559_v1 }
 0x33b   :  { %v1323_v41 = vpop.eup %1322 }
 0x33c   :  { %v1032_v42 = vadd.f32 1.0, %v1323_v41 }
 0x33e   :  { %1324 = vlog2.f32 %v1032_v42 }
 0x346   :  { %v1024_v44 = vpop.xlane.xlu0 %1023 }
 0x347   :  { %v1025_v45 = vadd.f32 %v1024_v44, %v868_v26 }
 0x348   :  { %v1325_v46 = vpop.eup %1324 }
 0x349   :  { %v1052_v49 = vand.u32 2147483647, %v1025_v45  ;;  %v1034_v50 = vmul.f32 0.6931472, %v1325_v46  ;;  %v1051_v19 = vmax.f32 %v1025_v45, 0.0 }
 0x34a   :  { %v532_v54 = vpop.xlane.xlu0 %531 }
 0x34b   :  { %v1053_v55 = vsub.f32 0.0, %v1052_v49  ;;  %v533_v58 = vrot.slane %v532_v54, 4  ;;  %v1035_v60 = vadd.f32 %v1034_v50, %v1027_v47 }
 0x34d   :  { %v1054_v61 = vmul.f32 1.442695, %v1053_v55  ;;  %v534_v62 = vadd.f32 %v533_v58, %v532_v54  ;;  %v1036_v63 = vmin.f32 %v1035_v60, 100.0 }
 0x34f   :  { %1326 = vpow2.f32 %v1054_v61  ;;  %v535_v2 = vrot.slane %v534_v62, 2  ;;  %v1038_v52 = vsel %vm1037_vm2, %v1036_v63, 0.0 }
 0x350   :  { %1039 = vadd.xlane.f32.xlu0 %v1038_v52 }
 0x351   :  { %v536_v16 = vadd.f32 %v535_v2, %v534_v62 }
 0x353   :  { %v537_v57 = vrot.slane %v536_v16, 1 }
 0x355   :  { %v538_v59 = vadd.f32 %v537_v57, %v536_v16 }
 0x357   :  { %1272 = vpush %v538_v59 }
 0x358   :  { %1274 = vpush %v561_v3 }
 0x359   :  { %v1327_v4 = vpop.eup %1326 }
 0x35a   :  { %v1056_v17 = vadd.f32 1.0, %v1327_v4 }
 0x35c   :  { %1328 = vlog2.f32 %v1056_v17 }
 0x366   :  { %v1329_v5 = vpop.eup %1328 }
 0x367   :  { %v1058_v6 = vmul.f32 0.6931472, %v1329_v5 }
 0x368   :  { %s1271_s25 = spop %1270 }
 0x369   :  { %v1059_v7 = vadd.f32 %v1058_v6, %v1051_v19 }
 0x36b   :  { %v1060_v48 = vmin.f32 %v1059_v7, 100.0 }
 0x36d   :  { %v1061_v20 = vsel %vm1037_vm2, %v1060_v48, 0.0 }
 0x36e   :  { %1062 = vadd.xlane.f32.xlu1 %v1061_v20 }
 0x388   :  { %s1273_s26 = spop %1272 }
 0x389   :  { %s1275_s0 = spop %1274  ;;  %s540_s21 = sadd.f32 %s1273_s26, %s1271_s25 }
 0x38a   :  { %s563_s27 = smul.f32 2.0, %s1275_s0 }
 0x38c   :  { %s564_s29 = ssub.f32 %s540_s21, %s563_s27 }
 0x38e   :  { %s567_s9 = smul.f32 0.015625, %s564_s29 }
 0x3dd   :  { %v1040_v8 = vpop.xlane.xlu0 %1039 }
 0x3de   :  { %v1041_v53 = vrot.slane %v1040_v8, 4 }
 0x3e0   :  { %v1042_v9 = vadd.f32 %v1041_v53, %v1040_v8 }
 0x3e2   :  { %v1043_v10 = vrot.slane %v1042_v9, 2 }
 0x3e4   :  { %v1044_v21 = vadd.f32 %v1043_v10, %v1042_v9 }
 0x3e6   :  { %v1045_v11 = vrot.slane %v1044_v21, 1 }
 0x3e8   :  { %v1046_v12 = vadd.f32 %v1045_v11, %v1044_v21 }
 0x3ea   :  { %1276 = vpush %v1046_v12 }
 0x3fb   :  { %v1063_v13 = vpop.xlane.xlu1 %1062 }
 0x3fc   :  { %v1064_v15 = vrot.slane %v1063_v13, 4 }
 0x3fe   :  { %v1065_v24 = vadd.f32 %v1064_v15, %v1063_v13 }
 0x400   :  { %v1066_v22 = vrot.slane %v1065_v24, 2 }
 0x402   :  { %v1067_v27 = vadd.f32 %v1066_v22, %v1065_v24 }
 0x404   :  { %v1068_v0 = vrot.slane %v1067_v27, 1 }
 0x406   :  { %v1069_v14 = vadd.f32 %v1068_v0, %v1067_v27 }
 0x408   :  { %1278 = vpush %v1069_v14 }
 0x41b   :  { %s1277_s28 = spop %1276 }
 0x41c   :  { %s1050_s30 = smul.f32 0.125, %s1277_s28 }
 0x439   :  { %s1279_s6 = spop %1278 }
 0x43a   :  { %s1073_s7 = smul.f32 0.125, %s1279_s6 }
 0x43c   :  { %s1074_s8 = sadd.f32 %s1073_s7, %s1050_s30 }
 0x43e   :  { %s1075_s10 = smul.f32 0.5, %s1074_s8 }
 0x440   :  { %s1076_s11 = sadd.f32 %s1075_s10, %s567_s9 }
 0x442   :  { %1078 = sst [smem:[#allocation10]] %s1076_s11 }
 0x443   :  { %1427 = shalt.err (!%p1424_p6)
}
 0x444   :  { %s1445_s15 = smov [#allocation10]  }
 0x445   :  { %1086 = dma.smem_to_hbm %s1445_s15, 16, %s1696_s5, [#allocation4]  }
 0x446   :  { %1434 = dma.done.wait [#allocation4], 16  }
 0x447   :  { %1435 = vsyncadd [#allocation4], 4294967280 }
 0x448   :  { %1090 = sfence }
 0x449   :  { %1091 = vsyncpa [#allocation3], 1 }
 0x44a   :  { %1092 = vsyncpa [#allocation6], 1 }
 0x44b   :  { %1093 = vsyncpa [#allocation9], 1 }
 0x44c   :  { %1094 = vsyncpa [#allocation4], 1 }

</bundles_post_ra>
